<compile_context>
chip_gen: v7x
topology: tpu7x:2x2x1
jax: 0.10.0
libtpu: 0.0.40
codegen_flags: <defaults>
</compile_context>

<pallas_src>
import jax
import jax.numpy as jnp
from jax.experimental import pallas as pl
from jax.experimental.pallas import tpu as pltpu


def _round_up(n, m):
    return ((n + m - 1) // m) * m


# ---------------------------------------------------------------------------
# Pallas kernel (per batch tile, batch along the lane axis)
# ---------------------------------------------------------------------------
def ctrcvr_kernel(x_ref, sh_ref, w1_ref, b1_ref, w2_ref, b2_ref, wh_ref,
                  out_ref):
    """Shapes (tb = batch tile, lane axis):
       x_ref  : (d_in, tb) bf16   input features, transposed
       sh_ref : (2, tb)    f32    precomputed side-branch head (row0=ctr, row1=cvr)
       w1_ref : (64, d_in) bf16   fc1 weight (transposed)
       b1_ref : (64, 1)    f32
       w2_ref : (32, 64)   bf16   fc2 weight (transposed)
       b2_ref : (32, 1)    f32
       wh_ref : (2, 32)    bf16   fused ctr/cvr head weights acting on h2 (transposed)
       out_ref: (2, tb)    f32    sigmoid(ctr/cvr), lane-dense
    """
    # fc1 + relu : (64, d_in) @ (d_in, tb), bf16 operands, f32 accumulate.
    h1 = jnp.dot(w1_ref[...], x_ref[...], preferred_element_type=jnp.float32)
    h1 = jnp.maximum(h1 + b1_ref[...], 0.0).astype(jnp.bfloat16)

    # fc2 + relu : (32, 64) @ (64, tb)
    h2 = jnp.dot(w2_ref[...], h1, preferred_element_type=jnp.float32)
    h2 = jnp.maximum(h2 + b2_ref[...], 0.0).astype(jnp.bfloat16)

    # Fused CTR/CVR head: (2, 32) @ (32, tb); side-feature part + bias was
    # folded into sh_ref by the wrapper.
    logit = jnp.dot(wh_ref[...], h2,
                    preferred_element_type=jnp.float32) + sh_ref[...]

    # sigmoid: exp + approximate reciprocal on the EUP.
    out_ref[...] = pl.reciprocal(1.0 + jnp.exp(-logit), approx=True)


# ---------------------------------------------------------------------------
# Wrapper
# ---------------------------------------------------------------------------
def ctrcvr_forward(params, query_terms, doc_terms, user_id, item_id, x,
                   *, tile_b=1024):
    f32, bf16 = jnp.float32, jnp.bfloat16

    # --- XLA glue: embedding gathers, mean-pool, side concat, side-head GEMM.
    user_emb = jnp.take(params["user_table"], user_id, axis=0)              # (B, E)
    item_emb = jnp.take(params["item_table"], item_id, axis=0)              # (B, E)
    q_avg = jnp.mean(jnp.take(params["term_table"], query_terms, axis=0), axis=1)
    d_avg = jnp.mean(jnp.take(params["term_table"], doc_terms, axis=0), axis=1)
    side = jnp.concatenate([user_emb, item_emb, q_avg, d_avg], axis=-1).astype(f32)

    # Fuse the two heads (col 0 = ctr, col 1 = cvr); split point derived from
    # the fc2 hidden width so the fusion never silently misaligns.
    h2_dim = params["w2"].shape[1]
    w_head = jnp.concatenate([params["w_ctr"], params["w_cvr"]], axis=1)    # (feat, 2)
    b_head = jnp.concatenate([params["b_ctr"], params["b_cvr"]], axis=1)    # (1, 2)
    w_head_h2 = w_head[:h2_dim]                                             # (h2_dim, 2)
    w_head_side = w_head[h2_dim:]                                           # (side, 2)

    # Rank-2 side projection stays in XLA (fuses with the gathers); transposed
    # so the kernel's batch axis is the lane axis.  Kept f32 (exact).
    side_head_t = (side @ w_head_side + b_head).T                           # (2, B)

    # Transposed, bf16 matmul operands; biases stay f32.
    x_t = x.T.astype(bf16)                                                  # (d_in, B)
    w1_t = params["w1"].T.astype(bf16)                                      # (64, d_in)
    b1_t = params["b1"].T.astype(f32)                                       # (64, 1)
    w2_t = params["w2"].T.astype(bf16)                                      # (32, 64)
    b2_t = params["b2"].T.astype(f32)                                       # (32, 1)
    wh_t = w_head_h2.T.astype(bf16)                                         # (2, h2_dim)

    d_in, B = x_t.shape

    # Batch tile (lane dim): full array for small B (single tile), otherwise a
    # multiple of 128 with >=2 grid steps so both v7x TensorCores get work.
    if B <= 256:
        tb = B
    else:
        tb = min(_round_up(tile_b, 128), _round_up(pl.cdiv(B, 2), 128))
    grid = (pl.cdiv(B, tb),)   # ragged last block handled by Pallas; no jnp.pad

    def tile_spec(rows):
        return pl.BlockSpec((rows, tb), lambda i: (0, i))

    def const_spec(shape):
        return pl.BlockSpec(shape, lambda i: (0, 0))

    cost = pl.CostEstimate(
        flops=2 * B * (d_in * 64 + 64 * 32 + h2_dim * 2),
        transcendentals=2 * B,
        bytes_accessed=(x_t.size * 2 + side_head_t.size * 4 + 2 * B * 4
                        + (w1_t.size + w2_t.size + wh_t.size) * 2
                        + (b1_t.size + b2_t.size) * 4),
    )

    out_t = pl.pallas_call(
        ctrcvr_kernel,
        out_shape=jax.ShapeDtypeStruct((2, B), f32),
        grid=grid,
        in_specs=[
            tile_spec(d_in),           # x (transposed)
            tile_spec(2),              # side-branch head (transposed)
            const_spec(w1_t.shape),    # fc1 weight   (VMEM-resident)
            const_spec(b1_t.shape),    # fc1 bias
            const_spec(w2_t.shape),    # fc2 weight
            const_spec(b2_t.shape),    # fc2 bias
            const_spec(wh_t.shape),    # fused head weights (h2 rows)
        ],
        out_specs=pl.BlockSpec((2, tb), lambda i: (0, i)),
        compiler_params=pltpu.CompilerParams(
            dimension_semantics=("parallel",),          # megacore sharding
            vmem_limit_bytes=32 * 1024 * 1024,
        ),
        cost_estimate=cost,
    )(x_t, side_head_t, w1_t, b1_t, w2_t, b2_t, wh_t)

    ctr = out_t[0, :, None]
    cvr = out_t[1, :, None]
    return ctr, cvr


# ---------------------------------------------------------------------------
# Pure-JAX reference (for correctness check only)
# ---------------------------------------------------------------------------
def ctrcvr_reference(params, query_terms, doc_terms, user_id, item_id, x):
    h = jnp.maximum(x @ params["w1"] + params["b1"], 0.0)
    h = jnp.maximum(h @ params["w2"] + params["b2"], 0.0)
    ue = jnp.take(params["user_table"], user_id, axis=0)
    ie = jnp.take(params["item_table"], item_id, axis=0)
    qa = jnp.mean(jnp.take(params["term_table"], query_terms, axis=0), axis=1)
    da = jnp.mean(jnp.take(params["term_table"], doc_terms, axis=0), axis=1)
    feat = jnp.concatenate([h, ue, ie, qa, da], axis=-1)
    ctr = jax.nn.sigmoid(feat @ params["w_ctr"] + params["b_ctr"])
    cvr = jax.nn.sigmoid(feat @ params["w_cvr"] + params["b_cvr"])
    return ctr, cvr


# ---------------------------------------------------------------------------
# Deterministic parameter construction
# ---------------------------------------------------------------------------
def make_params(key, input_dim, user_id_dim, item_id_dim, term_vocab_size,
                embedding_dim=8):
    ks = jax.random.split(key, 9)
    feat_dim = 32 + 2 * embedding_dim + embedding_dim * 2   # = 64
    f = jnp.float32
    return {
        "w1": jax.random.normal(ks[0], (input_dim, 64), f) * 0.1,
        "b1": jax.random.normal(ks[1], (1, 64), f) * 0.01,
        "w2": jax.random.normal(ks[2], (64, 32), f) * 0.1,
        "b2": jax.random.normal(ks[3], (1, 32), f) * 0.01,
        "user_table": jax.random.normal(ks[4], (user_id_dim, embedding_dim), f),
        "item_table": jax.random.normal(ks[5], (item_id_dim, embedding_dim), f),
        "term_table": jax.random.normal(ks[6], (term_vocab_size, embedding_dim), f),
        "w_ctr": jax.random.normal(ks[7], (feat_dim, 1), f) * 0.1,
        "b_ctr": jnp.zeros((1, 1), f),
        "w_cvr": jax.random.normal(ks[8], (feat_dim, 1), f) * 0.1,
        "b_cvr": jnp.zeros((1, 1), f),
    }


if __name__ == "__main__":
    # Small shapes consistent with the module's forward.
    B = 8
    INPUT_DIM = 16
    QUERY_LEN = 10
    DOC_LEN = 50
    EMB = 8
    USER_VOCAB = 100
    ITEM_VOCAB = 200
    TERM_VOCAB = 100

    key = jax.random.PRNGKey(0)
    kp, kq, kd, ku, ki, kx = jax.random.split(key, 6)

    params = make_params(kp, INPUT_DIM, USER_VOCAB, ITEM_VOCAB, TERM_VOCAB, EMB)

    query_terms = jax.random.randint(kq, (B, QUERY_LEN), 0, TERM_VOCAB, dtype=jnp.int32)
    doc_terms   = jax.random.randint(kd, (B, DOC_LEN),   0, TERM_VOCAB, dtype=jnp.int32)
    user_id     = jax.random.randint(ku, (B,), 0, USER_VOCAB, dtype=jnp.int32)
    item_id     = jax.random.randint(ki, (B,), 0, ITEM_VOCAB, dtype=jnp.int32)
    x           = jax.random.normal(kx, (B, INPUT_DIM), jnp.float32)

    ctr, cvr = ctrcvr_forward(params, query_terms, doc_terms, user_id, item_id, x)
    jax.block_until_ready((ctr, cvr))

    ctr_ref, cvr_ref = ctrcvr_reference(params, query_terms, doc_terms,
                                        user_id, item_id, x)
    assert ctr.shape == (B, 1) and cvr.shape == (B, 1)
    # Tolerance covers bf16 matmul operands (~2^-8 rel on the logit's h2 path)
    # plus the EUP approximate reciprocal (~2^-12) in the sigmoid.
    assert jnp.allclose(ctr, ctr_ref, atol=1e-2, rtol=1e-2)
    assert jnp.allclose(cvr, cvr_ref, atol=1e-2, rtol=1e-2)

    print("KERNEL_OK")
</pallas_src>

<mosaic_0001>
module attributes {stable_mosaic.version = 11 : i64} {
  func.func @ctrcvr_kernel(%arg0: i32, %arg1: memref<16x8xbf16, #tpu.memory_space<vmem>>, %arg2: memref<2x8xf32, #tpu.memory_space<vmem>>, %arg3: memref<64x16xbf16, #tpu.memory_space<vmem>>, %arg4: memref<64x1xf32, #tpu.memory_space<vmem>>, %arg5: memref<32x64xbf16, #tpu.memory_space<vmem>>, %arg6: memref<32x1xf32, #tpu.memory_space<vmem>>, %arg7: memref<2x32xbf16, #tpu.memory_space<vmem>>, %arg8: memref<2x8xf32, #tpu.memory_space<vmem>>) attributes {dimension_semantics = [#tpu.dimension_semantics<parallel>], iteration_bounds = array<i64: 1>, scalar_prefetch = 0 : i64, scratch_operands = 0 : i64, tpu.core_type = #tpu.core_type<tc>, window_params = [{transform_indices = @transform_0, window_bounds = array<i64: 16, 8>}, {transform_indices = @transform_1, window_bounds = array<i64: 2, 8>}, {pipeline_mode = #tpu.pipeline_mode<synchronous>, transform_indices = @transform_2, window_bounds = array<i64: 64, 16>}, {pipeline_mode = #tpu.pipeline_mode<synchronous>, transform_indices = @transform_3, window_bounds = array<i64: 64, 1>}, {pipeline_mode = #tpu.pipeline_mode<synchronous>, transform_indices = @transform_4, window_bounds = array<i64: 32, 64>}, {pipeline_mode = #tpu.pipeline_mode<synchronous>, transform_indices = @transform_5, window_bounds = array<i64: 32, 1>}, {pipeline_mode = #tpu.pipeline_mode<synchronous>, transform_indices = @transform_6, window_bounds = array<i64: 2, 32>}, {transform_indices = @transform_7, window_bounds = array<i64: 2, 8>}]} {
    %c0 = arith.constant 0 : index
    %c0_0 = arith.constant 0 : index
    %0 = vector.load %arg3[%c0, %c0_0] : memref<64x16xbf16, #tpu.memory_space<vmem>>, vector<64x16xbf16>
    %c0_1 = arith.constant 0 : index
    %c0_2 = arith.constant 0 : index
    %1 = vector.load %arg1[%c0_1, %c0_2] : memref<16x8xbf16, #tpu.memory_space<vmem>>, vector<16x8xbf16>
    %cst = arith.constant dense<0.000000e+00> : vector<64x8xf32>
    %2 = tpu.matmul %0, %1, %cst {dimension_numbers = #tpu.dot_dimension_numbers<[1], [0], [0], [1], [0, 0, 1, 1], [], []>} : vector<64x16xbf16>, vector<16x8xbf16>, vector<64x8xf32> -> vector<64x8xf32>
    %c0_3 = arith.constant 0 : index
    %c0_4 = arith.constant 0 : index
    %3 = vector.load %arg4[%c0_3, %c0_4] : memref<64x1xf32, #tpu.memory_space<vmem>>, vector<64x1xf32>
    %4 = vector.broadcast %3 : vector<64x1xf32> to vector<64x8xf32>
    %5 = arith.addf %2, %4 : vector<64x8xf32>
    %cst_5 = arith.constant 0.000000e+00 : f32
    %6 = vector.broadcast %cst_5 : f32 to vector<64x8xf32>
    %7 = arith.maximumf %5, %6 : vector<64x8xf32>
    %8 = arith.truncf %7 : vector<64x8xf32> to vector<64x8xbf16>
    %c0_6 = arith.constant 0 : index
    %c0_7 = arith.constant 0 : index
    %9 = vector.load %arg5[%c0_6, %c0_7] : memref<32x64xbf16, #tpu.memory_space<vmem>>, vector<32x64xbf16>
    %cst_8 = arith.constant dense<0.000000e+00> : vector<32x8xf32>
    %10 = tpu.matmul %9, %8, %cst_8 {dimension_numbers = #tpu.dot_dimension_numbers<[1], [0], [0], [1], [0, 0, 1, 1], [], []>} : vector<32x64xbf16>, vector<64x8xbf16>, vector<32x8xf32> -> vector<32x8xf32>
    %c0_9 = arith.constant 0 : index
    %c0_10 = arith.constant 0 : index
    %11 = vector.load %arg6[%c0_9, %c0_10] : memref<32x1xf32, #tpu.memory_space<vmem>>, vector<32x1xf32>
    %12 = vector.broadcast %11 : vector<32x1xf32> to vector<32x8xf32>
    %13 = arith.addf %10, %12 : vector<32x8xf32>
    %cst_11 = arith.constant 0.000000e+00 : f32
    %14 = vector.broadcast %cst_11 : f32 to vector<32x8xf32>
    %15 = arith.maximumf %13, %14 : vector<32x8xf32>
    %16 = arith.truncf %15 : vector<32x8xf32> to vector<32x8xbf16>
    %c0_12 = arith.constant 0 : index
    %c0_13 = arith.constant 0 : index
    %17 = vector.load %arg7[%c0_12, %c0_13] : memref<2x32xbf16, #tpu.memory_space<vmem>>, vector<2x32xbf16>
    %cst_14 = arith.constant dense<0.000000e+00> : vector<2x8xf32>
    %18 = tpu.matmul %17, %16, %cst_14 {dimension_numbers = #tpu.dot_dimension_numbers<[1], [0], [0], [1], [0, 0, 1, 1], [], []>} : vector<2x32xbf16>, vector<32x8xbf16>, vector<2x8xf32> -> vector<2x8xf32>
    %c0_15 = arith.constant 0 : index
    %c0_16 = arith.constant 0 : index
    %19 = vector.load %arg2[%c0_15, %c0_16] : memref<2x8xf32, #tpu.memory_space<vmem>>, vector<2x8xf32>
    %20 = arith.addf %18, %19 : vector<2x8xf32>
    %cst_17 = arith.constant 0.000000e+00 : f32
    %21 = vector.broadcast %cst_17 : f32 to vector<2x8xf32>
    %22 = arith.subf %21, %20 : vector<2x8xf32>
    %23 = math.exp %22 : vector<2x8xf32>
    %cst_18 = arith.constant 1.000000e+00 : f32
    %24 = vector.broadcast %cst_18 : f32 to vector<2x8xf32>
    %25 = arith.addf %24, %23 : vector<2x8xf32>
    %26 = tpu.reciprocal %25 {approx = true} : vector<2x8xf32> -> vector<2x8xf32>
    %c0_19 = arith.constant 0 : index
    %c0_20 = arith.constant 0 : index
    %27 = vector.load %arg8[%c0_19, %c0_20] : memref<2x8xf32, #tpu.memory_space<vmem>>, vector<2x8xf32>
    tpu.vector_store %arg8[%c0_19, %c0_20], %26 {strides = array<i32>} : memref<2x8xf32, #tpu.memory_space<vmem>>, vector<2x8xf32>,
    return
  }
  func.func @transform_0(%arg0: i32) -> (i32, i32) {
    %c0_i32 = arith.constant 0 : i32
    %c0_i32_0 = arith.constant 0 : i32
    return %c0_i32, %arg0 : i32, i32
  }
  func.func @transform_1(%arg0: i32) -> (i32, i32) {
    %c0_i32 = arith.constant 0 : i32
    %c0_i32_0 = arith.constant 0 : i32
    return %c0_i32, %arg0 : i32, i32
  }
  func.func @transform_2(%arg0: i32) -> (i32, i32) {
    %c0_i32 = arith.constant 0 : i32
    %c0_i32_0 = arith.constant 0 : i32
    %c0_i32_1 = arith.constant 0 : i32
    return %c0_i32, %c0_i32_0 : i32, i32
  }
  func.func @transform_3(%arg0: i32) -> (i32, i32) {
    %c0_i32 = arith.constant 0 : i32
    %c0_i32_0 = arith.constant 0 : i32
    %c0_i32_1 = arith.constant 0 : i32
    return %c0_i32, %c0_i32_0 : i32, i32
  }
  func.func @transform_4(%arg0: i32) -> (i32, i32) {
    %c0_i32 = arith.constant 0 : i32
    %c0_i32_0 = arith.constant 0 : i32
    %c0_i32_1 = arith.constant 0 : i32
    return %c0_i32, %c0_i32_0 : i32, i32
  }
  func.func @transform_5(%arg0: i32) -> (i32, i32) {
    %c0_i32 = arith.constant 0 : i32
    %c0_i32_0 = arith.constant 0 : i32
    %c0_i32_1 = arith.constant 0 : i32
    return %c0_i32, %c0_i32_0 : i32, i32
  }
  func.func @transform_6(%arg0: i32) -> (i32, i32) {
    %c0_i32 = arith.constant 0 : i32
    %c0_i32_0 = arith.constant 0 : i32
    %c0_i32_1 = arith.constant 0 : i32
    return %c0_i32, %c0_i32_0 : i32, i32
  }
  func.func @transform_7(%arg0: i32) -> (i32, i32) {
    %c0_i32 = arith.constant 0 : i32
    %c0_i32_0 = arith.constant 0 : i32
    return %c0_i32, %arg0 : i32, i32
  }
}

</mosaic_0001>

<bundles_post_ra>
// kernel: tpu_custom_call.1
= control target key start
LH: loop header
LB: loop body
LE: loop exit
PB: predicated region body
PF: predicated region fallthrough
CT: control target
= control target key end

     0   :  { %vm112_vm0 = vcmask 130048   ;;  %v468_v3 = vmov 0   ;;  %s593_s0 = inlined_call_operand.vmem [shape: bf16[16,8], index: 0, kind: input, shape index: {}]   ;;  %s594_s1 = inlined_call_operand.vmem [shape: f32[2,8], index: 1, kind: input, shape index: {}]   ;;  %s595_s2 = inlined_call_operand.vmem [shape: bf16[64,16], index: 2, kind: input, shape index: {}]   ;;  %s596_s3 = inlined_call_operand.vmem [shape: f32[64,1], index: 3, kind: input, shape index: {}]   ;;  %s597_s4 = inlined_call_operand.vmem [shape: bf16[32,64], index: 4, kind: input, shape index: {}]   ;;  %s598_s5 = inlined_call_operand.vmem [shape: f32[32,1], index: 5, kind: input, shape index: {}]   ;;  %s599_s6 = inlined_call_operand.vmem [shape: bf16[2,32], index: 6, kind: input, shape index: {}]   ;;  %s600_s7 = inlined_call_operand.hbm [shape: f32[2,8], index: 7, kind: output, shape index: {}]  }
   0x1   :  { %v433_v0 = vld [vmem:[%s593_s0] sm:$0xff]   ;;  %v435_v2 = vld [vmem:[%s595_s2 + $0x8] sm:$0xff]   ;;  %431 = vset.pattern.permute.xlu0 %v468_v3  ;;  %v436_v4 = vld [vmem:[%s595_s2 + $0x10] sm:$0xff]   ;;  %432 = vset.pattern.permute.xlu1 %v468_v3 }
   0x2   :  { %v434_v1 = vld [vmem:[%s595_s2] sm:$0xff]   ;;  %397 = vmatprep.subr.bf16.mxu0 %v433_v0  ;;  %v40_v6 = vld [vmem:[%s596_s3 + $0x10] sm:$0xff]  ;;  %v39_v7 = vld [vmem:[%s596_s3 + $0x8] sm:$0xff] }
   0x3   :  { %398 = vmatpush3.bf16.msra.mxu0 %v433_v0  ;;  %399 = vmatprep.mubr.msk.bf16.mxu0 %vm112_vm0, %v434_v1  ;;  %v38_v5 = vld [vmem:[%s596_s3] sm:$0xff]  ;;  %v41_v8 = vld [vmem:[%s596_s3 + $0x18] sm:$0xff] }
   0x4   :  { %48 = vperm.xlu0 %431, %v38_v5   ;;  %58 = vperm.xlu1 %432, %v40_v6   ;;  %v437_v9 = vld [vmem:[%s595_s2 + $0x18] sm:$0xff]  }
   0x6   :  { %400 = vmatmul.mubr.msk.bf16.vlgmr.msra.gmra.mrb[0].mxu0 %vm112_vm0, %v435_v2 }
   0x7   :  { %403 = vmatprep.mubr.msk.bf16.mxu0 %vm112_vm0, %v436_v4 }
   0x8   :  { %53 = vperm.xlu0 %431, %v39_v7  }
   0x9   :  { %12 = vsyncpa [#allocation3], 0  ;;  %63 = vperm.xlu1 %432, %v41_v8   ;;  %v42_v10 = vld [vmem:[%s596_s3 + $0x20] sm:$0xff]  ;;  %v43_v11 = vld [vmem:[%s596_s3 + $0x28] sm:$0xff]  ;;  %vm240_vm1 = vcmask 523264   ;;  %v469_v56 = vmov 0.0  }
   0xa   :  { %v44_v12 = vld [vmem:[%s596_s3 + $0x30] sm:$0xff]  ;;  %v45_v13 = vld [vmem:[%s596_s3 + $0x38] sm:$0xff]  ;;  %v206_v14 = vld [vmem:[%s598_s5] sm:$0xff]  ;;  %419 = vmatprep.subr.bf16.mxu0 %v469_v56  ;;  %vm470_vm2 = vmmov 0   ;;  %vm304_vm3 = vcmask 261120   ;;  %s471_s14 = smov [#allocation2]  }
   0xb   :  { %v207_v15 = vld [vmem:[%s598_s5 + $0x8] sm:$0xff]  ;;  %v208_v16 = vld [vmem:[%s598_s5 + $0x10] sm:$0xff]  ;;  %v209_v17 = vld [vmem:[%s598_s5 + $0x18] sm:$0xff]  ;;  %s361_s15 = sshll.u32 %s471_s14, 4  ;;  %vm353_vm4 = vcmask 58368   ;;  %s362_s15 = int_to_ptr.vmem [resolvable:$true] %s361_s15 }
   0xc   :  { %68 = vperm.xlu0 %431, %v42_v10   ;;  %v438_v18 = vld [vmem:[%s597_s4] sm:$0xff]   ;;  %v439_v55 = vld [vmem:[%s597_s4 + $0x8] sm:$0xff]   ;;  %p449_p1 = scmp.lt.s32.totalorder %s362_s15, %s362_s15 }
   0xd   :  { %73 = vperm.xlu1 %432, %v43_v11   ;;  %415 = vmatprep.mubr.msk.bf16.mxu1 %vm240_vm1, %v438_v18  ;;  %v302_v11 = vld [vmem:[%s599_s6] sm:$0x1]  ;;  %s444_s6 = scalar_lea.vmem %s362_s15, 32 }
   0xe   :  { %404 = vmatmul.mubr.msk.bf16.gmra.mrb[4].mxu0 %vm112_vm0, %v437_v9  ;;  %p445_p0 = scmp.ne.s32.totalorder %s362_s15, %s444_s6  ;;  %p450_p2 = scmp.lt.s32.totalorder %s444_s6, %s444_s6 }
   0xf   :  { %423 = vmatprep.mubr.msk.bf16.mxu0 %vm470_vm2, %v469_v56 }
  0x10   :  { %78 = vperm.xlu0 %431, %v44_v12   ;;  %v303_v12 = vld [vmem:[%s594_s1] sm:$0x3]  ;;  %p451_p3 = por %p450_p2, %p449_p1 }
  0x11   :  { %83 = vperm.xlu1 %432, %v45_v13  }
  0x12   :  { %p452_p4 = pnand %p451_p3, %p445_p0 }
  0x14   :  { %212 = vperm.xlu0 %431, %v206_v14  }
  0x15   :  { %217 = vperm.xlu1 %432, %v207_v15  }
  0x18   :  { %222 = vperm.xlu0 %431, %v208_v16  }
  0x19   :  { %227 = vperm.xlu1 %432, %v209_v17  }
  0x83   :  { %v49_v19 = vpop.permute.xlu0 %48  ;;  %v59_v20 = vpop.permute.xlu1 %58 }
  0x87   :  { %v54_v21 = vpop.permute.xlu0 %53 }
  0x88   :  { %v64_v22 = vpop.permute.xlu1 %63 }
  0x8b   :  { %v69_v26 = vpop.permute.xlu0 %68 }
  0x8c   :  { %v74_v31 = vpop.permute.xlu1 %73 }
  0x8f   :  { %v79_v38 = vpop.permute.xlu0 %78 }
  0x90   :  { %v84_v43 = vpop.permute.xlu1 %83 }
  0x93   :  { %v213_v57 = vpop.permute.xlu0 %212 }
  0x94   :  { %v218_v58 = vpop.permute.xlu1 %217 }
  0x97   :  { %v223_v59 = vpop.permute.xlu0 %222 }
  0x98   :  { %v228_v63 = vpop.permute.xlu1 %227 }
  0xd9   :  { %v401_v23 = vpop.f32.mrb[0].mxu0 }
  0xda   :  { %v168_v24 = vadd.f32 %v401_v23, %v59_v20  ;;  %v159_v25 = vpop.f32.mrb[1].mxu0 }
  0xdb   :  { %v160_v27 = vadd.f32 %v159_v25, %v49_v19  ;;  %v402_v28 = vpop.f32.mrb[2].mxu0 }
  0xdc   :  { %v171_v29 = vadd.f32 %v402_v28, %v64_v22  ;;  %v162_v30 = vpop.f32.mrb[3].mxu0  ;;  %v192_v33 = vmax.f32 %v168_v24, 0.0 }
  0xdd   :  { %v163_v32 = vadd.f32 %v162_v30, %v54_v21  ;;  %v190_v35 = vmax.f32 %v160_v27, 0.0 }
  0xde   :  { %v193_v34 = vmax.f32 %v171_v29, 0.0 }
  0xdf   :  { %v191_v36 = vmax.f32 %v163_v32, 0.0 }
  0xe0   :  { %v199_v37 = vpack.c.bf16 %v193_v34, %v192_v33 }
  0xe1   :  { %v405_v39 = vpop.f32.mrb[4].mxu0  ;;  %v198_v40 = vpack.c.bf16 %v191_v36, %v190_v35 }
  0xe2   :  { %v184_v41 = vadd.f32 %v405_v39, %v79_v38  ;;  %v175_v42 = vpop.f32.mrb[5].mxu0 }
  0xe3   :  { %v176_v44 = vadd.f32 %v175_v42, %v69_v26  ;;  %v406_v45 = vpop.f32.mrb[6].mxu0  ;;  %407 = vmatprep.subr.bf16.mxu1 %v198_v40 }
  0xe4   :  { %v187_v46 = vadd.f32 %v406_v45, %v84_v43  ;;  %v178_v47 = vpop.f32.mrb[7].mxu0  ;;  %408 = vmatpush3.bf16.msra.mxu1 %v198_v40  ;;  %v196_v49 = vmax.f32 %v184_v41, 0.0 }
  0xe5   :  { %v179_v48 = vadd.f32 %v178_v47, %v74_v31  ;;  %409 = vmatprep.subr.bf16.mxu1 %v199_v37  ;;  %v194_v51 = vmax.f32 %v176_v44, 0.0 }
  0xe6   :  { %v197_v50 = vmax.f32 %v187_v46, 0.0 }
  0xe7   :  { %v195_v52 = vmax.f32 %v179_v48, 0.0 }
  0xe8   :  { %v201_v53 = vpack.c.bf16 %v197_v50, %v196_v49  ;;  %410 = vmatpush3.bf16.msra.mxu1 %v199_v37 }
  0xe9   :  { %v200_v54 = vpack.c.bf16 %v195_v52, %v194_v51 }
  0xeb   :  { %411 = vmatprep.subr.bf16.mxu1 %v200_v54 }
  0xec   :  { %412 = vmatpush3.bf16.msra.mxu1 %v200_v54 }
  0xed   :  { %413 = vmatprep.subr.bf16.mxu1 %v201_v53 }
  0xf0   :  { %414 = vmatpush3.bf16.msra.mxu1 %v201_v53 }
  0xf3   :  { %416 = vmatmul.mubr.msk.bf16.vlgmr.msra.gmra.mrb[0].mxu1 %vm240_vm1, %v439_v55 }
 0x1c6   :  { %v417_v60 = vpop.f32.mrb[0].mxu1 }
 0x1c7   :  { %v290_v61 = vadd.f32 %v417_v60, %v223_v59  ;;  %v281_v62 = vpop.f32.mrb[1].mxu1 }
 0x1c8   :  { %v282_v0 = vadd.f32 %v281_v62, %v213_v57  ;;  %v418_v1 = vpop.f32.mrb[2].mxu1 }
 0x1c9   :  { %v293_v2 = vadd.f32 %v418_v1, %v228_v63  ;;  %v284_v3 = vpop.f32.mrb[3].mxu1  ;;  %v298_v5 = vmax.f32 %v290_v61, 0.0 }
 0x1ca   :  { %v285_v4 = vadd.f32 %v284_v3, %v218_v58  ;;  %v296_v7 = vmax.f32 %v282_v0, 0.0 }
 0x1cb   :  { %v299_v6 = vmax.f32 %v293_v2, 0.0 }
 0x1cc   :  { %v297_v8 = vmax.f32 %v285_v4, 0.0 }
 0x1cd   :  { %v301_v9 = vpack.c.bf16 %v299_v6, %v298_v5 }
 0x1ce   :  { %v300_v10 = vpack.c.bf16 %v297_v8, %v296_v7 }
 0x1d0   :  { %420 = vmatpush3.bf16.msra.mxu0 %v300_v10 }
 0x1d1   :  { %421 = vmatprep.subr.bf16.mxu0 %v469_v56 }
 0x1d4   :  { %422 = vmatpush3.bf16.msra.mxu0 %v301_v9 }
 0x1d7   :  { %424 = vmatmul.mubr.msk.bf16.vlgmr.msra.gmra.mrb[8].mxu0 %vm304_vm3, %v302_v11 }
 0x2aa   :  { %v342_v13 = vpop.f32.mrb[8].mxu0 }
 0x2ab   :  { %v343_v14 = vadd.f32 %v342_v13, %v303_v12  ;;  %v425_v15 = vpop.f32.mrb[9].mxu0 }
 0x2ac   :  { %v345_v16 = vpop.f32.mrb[10].mxu0 }
 0x2ad   :  { %v348_v17 = vsub.f32 0.0, %v343_v14  ;;  %v426_v18 = vpop.f32.mrb[11].mxu0 }
 0x2af   :  { %v349_v19 = vmul.f32 1.442695, %v348_v17 }
 0x2b1   :  { %440 = vpow2.f32 %v349_v19 }
 0x2bb   :  { %v441_v20 = vpop.eup %440 }
 0x2bc   :  { %v351_v21 = vadd.f32 1.0, %v441_v20 }
 0x2be   :  { %442 = vrcp.f32 %v351_v21 }
 0x2c8   :  { %v443_v22 = vpop.eup %442 }
 0x2c9   :  { %354 = vst.msk [vmem:[#allocation2] sm:$0x3] %vm353_vm4, %v443_v22 }
 0x2ca   :  { %455 = shalt.err (!%p452_p4)
}
 0x2cb   :  { %s456_s17 = scalar_lea.hbm %s600_s7, 32 }
 0x2cc   :  { %p457_p5 = scmp.ne.s32.totalorder %s600_s7, %s456_s17  ;;  %p460_p6 = scmp.lt.u32.totalorder %s456_s17, %s600_s7 }
 0x2ce   :  { %p462_p7 = pnand %p460_p6, %p457_p5 }
 0x2d0   :  { %465 = shalt.err (!%p462_p7)
}
 0x2d1   :  { %364 = dma.vmem_to_hbm [thread:$0]  %s362_s15, 32, %s600_s7, [#allocation3]  }
 0x2d2   :  { %466 = dma.done.wait [#allocation3], 32  }
 0x2d3   :  { %467 = vsyncadd [#allocation3], 4294967264 }
 0x2d4   :  { %368 = vsyncpa [#allocation3], 1 }

</bundles_post_ra>
